<compile_context>
chip_gen: v5e
topology: v5e:2x2
jax: 0.10.0
libtpu: 0.0.40
codegen_flags: <defaults>
</compile_context>

<pallas_src>
import numpy as np
import jax
import jax.numpy as jnp
from jax.experimental import pallas as pl
from jax.experimental.pallas import tpu as pltpu


def _round_up(x: int, m: int) -> int:
    return ((x + m - 1) // m) * m


def _sublane_multiple(dtype) -> int:
    # 8 rows for 32-bit, 16 for bf16, 32 for int8/fp8 (sub-32-bit packs along sublanes).
    return max(8, 32 // jnp.dtype(dtype).itemsize)


# ----------------------------- Pallas kernel -------------------------------
def _shift_equiv_kernel(x_ref, w_ref, b_ref, o_ref):
    """One (batch-tile, col-tile): out = x @ W_comb[:, j-block] + b_comb[j-block]."""
    acc = jnp.dot(x_ref[...], w_ref[...], preferred_element_type=jnp.float32)
    o_ref[...] = (acc + b_ref[...].astype(jnp.float32)).astype(o_ref.dtype)


# --------------------- one-time weight preparation --------------------------
def prepare_shift_equivariant_weights(real_mat, imag_mat, bias, *, weight_dtype=None):
    """Fuse the two fixed linear maps, transpose and lane-dense pad.

    Call ONCE per parameter update (not per forward call).

    real_mat, imag_mat: [D, D] (PyTorch row-major weights)
    bias:               [D, 2]
    returns: W_comb_p [Dp, Dp], b_comb_p [1, Dp]   with Dp = round_up(D, 128)
    """
    D = real_mat.shape[-1]
    Dp = _round_up(D, 128)
    pad = Dp - D
    hi = jax.lax.Precision.HIGHEST

    wr_t = jnp.transpose(real_mat).astype(jnp.float32)      # real_mat.T
    wi_t = jnp.transpose(imag_mat).astype(jnp.float32)      # imag_mat.T
    # out = (x @ Wr^T + b0) @ Wi^T + b1 = x @ (Wr^T @ Wi^T) + (b0 @ Wi^T + b1)
    w_comb = jnp.dot(wr_t, wi_t, precision=hi)                               # [D, D]
    b_comb = jnp.dot(bias[:, 0].astype(jnp.float32), wi_t, precision=hi) \
             + bias[:, 1].astype(jnp.float32)                                # [D]

    w_p = jnp.pad(w_comb, ((0, pad), (0, pad)))
    b_p = jnp.pad(b_comb, (0, pad))[None, :]                                 # [1, Dp]
    if weight_dtype is not None:
        # bf16 recommended on v5e/v6e/v7x for MXU-native throughput + half the VMEM.
        w_p = w_p.astype(weight_dtype)
    return w_p, b_p


# ------------------------------ forward pass --------------------------------
def shift_equivariant_forward_prepared(x, w_comb_p, b_comb_p, *,
                                       block_batch=256, block_n=None):
    """Fused forward with pre-prepared weights.

    x:         [B, D]
    w_comb_p:  [Dp, Dp] from prepare_shift_equivariant_weights
    b_comb_p:  [1, Dp]
    returns:   [B, D]
    """
    B, D = x.shape
    Dp = w_comb_p.shape[0]
    out_dtype = x.dtype
    xbytes = jnp.dtype(x.dtype).itemsize
    obytes = jnp.dtype(out_dtype).itemsize
    wbytes = jnp.dtype(w_comb_p.dtype).itemsize

    # ---- batch tile: dtype-correct sublane rounding; >=2 tiles for megacore ----
    sub = _sublane_multiple(x.dtype)
    TB = min(_round_up(block_batch, sub), _round_up(B, sub))
    if _round_up(B, TB) // TB < 2 and B > sub:
        TB = min(TB, _round_up((B + 1) // 2, sub))   # give both v7x TCs work
    Bp = _round_up(B, TB)

    # ---- output-column tile: keep one weight block within a VMEM budget ----
    if block_n is not None:
        TN = min(_round_up(block_n, 128), Dp)
    else:
        budget = 28 * 1024 * 1024
        if Dp * Dp * wbytes <= budget:
            TN = Dp
        else:
            TN = min(Dp, max(128, (budget // (Dp * wbytes)) // 128 * 128))
    while Dp % TN != 0:
        TN -= 128

    weight_resident = (TN == Dp)
    grid = (Bp // TB, Dp // TN)

    x_p = jnp.pad(x, ((0, Bp - B), (0, Dp - D)))

    # Constant-index (VMEM-resident) weight/bias blocks: single buffer.
    w_mode = pl.Buffered(1) if weight_resident else pl.Buffered(2)
    n_wbuf = 1 if weight_resident else 2

    # ---- explicit VMEM budget (default scoped limit is only 16/32 MiB) ----
    vmem_bytes = (n_wbuf * Dp * TN * wbytes            # W_comb block(s)
                  + n_wbuf * 8 * TN * 4                # bias block(s), sublane-padded
                  + 2 * TB * Dp * xbytes               # x double buffer
                  + 2 * TB * TN * obytes               # out double buffer
                  + (2 << 20))                         # compiler scratch slack
    vmem_limit = int(min(max(vmem_bytes, 32 << 20), 112 << 20))

    cost = pl.CostEstimate(
        flops=int(2 * Bp * Dp * Dp),
        transcendentals=0,
        bytes_accessed=int(Bp * Dp * xbytes + Bp * Dp * obytes
                           + Dp * Dp * wbytes * (1 if weight_resident else grid[0])
                           + Dp * 4),
    )

    out_p = pl.pallas_call(
        _shift_equiv_kernel,
        out_shape=jax.ShapeDtypeStruct((Bp, Dp), out_dtype),
        grid=grid,
        in_specs=[
            pl.BlockSpec((TB, Dp), lambda i, j: (i, 0)),                        # x: streamed
            pl.BlockSpec((Dp, TN), lambda i, j: (0, j), pipeline_mode=w_mode),  # W_comb
            pl.BlockSpec((1, TN), lambda i, j: (0, j), pipeline_mode=w_mode),   # b_comb
        ],
        out_specs=pl.BlockSpec((TB, TN), lambda i, j: (i, j)),
        compiler_params=pltpu.CompilerParams(
            dimension_semantics=("parallel", "parallel"),
            vmem_limit_bytes=vmem_limit,
        ),
        cost_estimate=cost,
    )(x_p, w_comb_p, b_comb_p)

    return out_p[:B, :D]


def shift_equivariant_forward(x, real_mat, imag_mat, bias, *,
                              block_batch=256, block_n=None, weight_dtype=None):
    """Convenience wrapper: fuses/pads weights then runs the kernel.

    For repeated calls with fixed params, call prepare_shift_equivariant_weights
    once and reuse shift_equivariant_forward_prepared (weight prep hoisted).
    """
    w_p, b_p = prepare_shift_equivariant_weights(real_mat, imag_mat, bias,
                                                 weight_dtype=weight_dtype)
    return shift_equivariant_forward_prepared(x, w_p, b_p,
                                              block_batch=block_batch,
                                              block_n=block_n)


# -------------------- deterministic parameter construction ------------------
def init_dft_matrices(dim: int):
    k = jnp.arange(dim, dtype=jnp.float32)
    angles = -2.0 * np.pi * jnp.outer(k, k) / dim
    dft = jnp.exp(1j * angles.astype(jnp.complex64))
    inv_dft = jnp.conj(dft).T / dim
    return dft, inv_dft


def init_shift_equivariant_params(dim: int, key):
    """Mimics ShiftEquivariantLayer._init_params: W = DFT diag(x) DFT^{-1}."""
    dft, inv_dft = init_dft_matrices(dim)
    diag_elements = jax.random.normal(key, (dim,), dtype=jnp.float32) / (dim ** 1.5)
    mat = dft @ jnp.diag(diag_elements.astype(jnp.complex64)) @ inv_dft
    real_mat = jnp.real(mat).astype(jnp.float32)     # [dim, dim]
    imag_mat = jnp.imag(mat).astype(jnp.float32)     # [dim, dim]
    params = jnp.concatenate([real_mat.reshape(-1), imag_mat.reshape(-1)])[None, :]
    return params, real_mat, imag_mat


def params_to_matrix(params, dim: int):
    num_groups = params.shape[0]
    real_mat = params[:, : dim ** 2].reshape(num_groups, dim, dim)
    imag_mat = params[:, dim ** 2:].reshape(num_groups, dim, dim)
    return real_mat, imag_mat


# ----------------------------------- main -----------------------------------
if __name__ == "__main__":
    dim = 32
    batch = 8

    key = jax.random.PRNGKey(0)
    k_params, k_x, k_bias = jax.random.split(key, 3)

    params, _, _ = init_shift_equivariant_params(dim, k_params)
    real_mat, imag_mat = params_to_matrix(params, dim)
    real_mat, imag_mat = real_mat[0], imag_mat[0]    # num_groups = 1

    # bias=True branch of the module (torch.rand(dim, 2)); bias=False is just zeros.
    bias = jax.random.uniform(k_bias, (dim, 2), dtype=jnp.float32)

    x = jax.random.normal(k_x, (batch, dim), dtype=jnp.float32)

    # One-time weight prep (hoisted out of the per-call path), then the kernel.
    w_comb_p, b_comb_p = prepare_shift_equivariant_weights(real_mat, imag_mat, bias)
    out = shift_equivariant_forward_prepared(x, w_comb_p, b_comb_p)
    out = jax.block_until_ready(out)

    # pure-JAX reference of the unfused PyTorch forward
    hi = jax.lax.Precision.HIGHEST
    y_ref = jnp.dot(x, real_mat.T, precision=hi) + bias[:, 0]
    out_ref = jnp.dot(y_ref, imag_mat.T, precision=hi) + bias[:, 1]
    np.testing.assert_allclose(np.asarray(out), np.asarray(out_ref),
                               rtol=1e-5, atol=1e-5)

    print("KERNEL_OK")
</pallas_src>

<mosaic_0001>
module attributes {stable_mosaic.version = 11 : i64} {
  func.func @_shift_equiv_kernel(%arg0: i32, %arg1: i32, %arg2: memref<8x128xf32, #tpu.memory_space<vmem>>, %arg3: memref<128x128xf32, #tpu.memory_space<vmem>>, %arg4: memref<1x128xf32, #tpu.memory_space<vmem>>, %arg5: memref<8x128xf32, #tpu.memory_space<vmem>>) attributes {dimension_semantics = [#tpu.dimension_semantics<parallel>, #tpu.dimension_semantics<parallel>], iteration_bounds = array<i64: 1, 1>, scalar_prefetch = 0 : i64, scratch_operands = 0 : i64, tpu.core_type = #tpu.core_type<tc>, window_params = [{transform_indices = @transform_0, window_bounds = array<i64: 8, 128>}, {pipeline_mode = #tpu.pipeline_mode<synchronous>, transform_indices = @transform_1, window_bounds = array<i64: 128, 128>}, {pipeline_mode = #tpu.pipeline_mode<synchronous>, transform_indices = @transform_2, window_bounds = array<i64: 1, 128>}, {transform_indices = @transform_3, window_bounds = array<i64: 8, 128>}]} {
    %c0 = arith.constant 0 : index
    %c0_0 = arith.constant 0 : index
    %0 = vector.load %arg2[%c0, %c0_0] : memref<8x128xf32, #tpu.memory_space<vmem>>, vector<8x128xf32>
    %c0_1 = arith.constant 0 : index
    %c0_2 = arith.constant 0 : index
    %1 = vector.load %arg3[%c0_1, %c0_2] : memref<128x128xf32, #tpu.memory_space<vmem>>, vector<128x128xf32>
    %cst = arith.constant dense<0.000000e+00> : vector<8x128xf32>
    %2 = tpu.matmul %0, %1, %cst {dimension_numbers = #tpu.dot_dimension_numbers<[1], [0], [0], [1], [0, 0, 1, 1], [], []>} : vector<8x128xf32>, vector<128x128xf32>, vector<8x128xf32> -> vector<8x128xf32>
    %c0_3 = arith.constant 0 : index
    %c0_4 = arith.constant 0 : index
    %3 = vector.load %arg4[%c0_3, %c0_4] : memref<1x128xf32, #tpu.memory_space<vmem>>, vector<1x128xf32>
    %4 = vector.broadcast %3 : vector<1x128xf32> to vector<8x128xf32>
    %5 = arith.addf %2, %4 : vector<8x128xf32>
    %c0_5 = arith.constant 0 : index
    %c0_6 = arith.constant 0 : index
    %6 = vector.load %arg5[%c0_5, %c0_6] : memref<8x128xf32, #tpu.memory_space<vmem>>, vector<8x128xf32>
    tpu.vector_store %arg5[%c0_5, %c0_6], %5 {strides = array<i32>} : memref<8x128xf32, #tpu.memory_space<vmem>>, vector<8x128xf32>,
    return
  }
  func.func @transform_0(%arg0: i32, %arg1: i32) -> (i32, i32) {
    %c0_i32 = arith.constant 0 : i32
    %c0_i32_0 = arith.constant 0 : i32
    return %arg0, %c0_i32 : i32, i32
  }
  func.func @transform_1(%arg0: i32, %arg1: i32) -> (i32, i32) {
    %c0_i32 = arith.constant 0 : i32
    %c0_i32_0 = arith.constant 0 : i32
    return %c0_i32, %arg1 : i32, i32
  }
  func.func @transform_2(%arg0: i32, %arg1: i32) -> (i32, i32) {
    %c0_i32 = arith.constant 0 : i32
    %c0_i32_0 = arith.constant 0 : i32
    return %c0_i32, %arg1 : i32, i32
  }
  func.func @transform_3(%arg0: i32, %arg1: i32) -> (i32, i32) {
    %c0_i32 = arith.constant 0 : i32
    return %arg0, %arg1 : i32, i32
  }
}

</mosaic_0001>

<bundles_post_ra>
// kernel: tpu_custom_call.1
= control target key start
LH: loop header
LB: loop body
LE: loop exit
PB: predicated region body
PF: predicated region fallthrough
CT: control target
= control target key end

     0   :  { %8 = vsyncpa [#allocation3], 0  ;;  %s226_s0 = inlined_call_operand.hbm [shape: f32[8,128], index: 0, kind: input, shape index: {}]   ;;  %s227_s1 = inlined_call_operand.hbm [shape: f32[128,128], index: 1, kind: input, shape index: {}]   ;;  %s228_s2 = inlined_call_operand.vmem [shape: f32[1,128], index: 2, kind: input, shape index: {}]   ;;  %s229_s3 = inlined_call_operand.hbm [shape: f32[8,128], index: 3, kind: output, shape index: {}]  }
   0x1   :  { %9 = vsyncpa [#allocation6], 0 }
   0x2   :  { %10 = vsyncpa [#allocation4], 0  ;;  %s16_s14 = sshll.u32 %s226_s0, 4  ;;  %s189_s15 = smov [#allocation2]   ;;  %s17_s14 = int_to_ptr.hbm [resolvable:$true] %s16_s14 }
   0x3   :  { %s18_s16 = sshll.u32 %s189_s15, 4  ;;  %s26_s19 = sshll.u32 %s227_s1, 4  ;;  %s19_s16 = int_to_ptr.vmem [resolvable:$true] %s18_s16  ;;  %s27_s19 = int_to_ptr.hbm [resolvable:$true] %s26_s19 }
   0x4   :  { %21 = dma.hbm_to_vmem [thread:$0]  %s17_s14, 128, %s19_s16, [#allocation3]  }
   0x5   :  { %s190_s20 = smov [#allocation5]   ;;  %s191_s22 = smov 128  }
   0x6   :  { %s28_s21 = sshll.u32 %s190_s20, 4  ;;  %s192_s23 = smov 8   ;;  %s29_s21 = int_to_ptr.vmem [resolvable:$true] %s28_s21 }
   0x7   :  { %34 = dma.hbm_to_vmem [thread:$0]  %s27_s19, 2048, %s29_s21, [#allocation6], %s191_s22, %s191_s22, %s192_s23  }
   0x8   :  { %183 = dma.done.wait [#allocation3], 128  }
   0x9   :  { %184 = vsyncadd [#allocation3], 4294967168 }
   0xa   :  { %185 = dma.done.wait [#allocation6], 2048  }
   0xb   :  { %186 = vsyncadd [#allocation6], 4294965248  ;;  %v61_v0 = vld [vmem:[#allocation5 + $0x78] sm:$0xff]  ;;  %v60_v1 = vld [vmem:[#allocation5 + $0x70] sm:$0xff]  ;;  %s193_s24 = smov [#allocation7]   ;;  %s94_s28 = sshll.u32 %s229_s3, 4  ;;  %s95_s28 = int_to_ptr.hbm [resolvable:$true] %s94_s28 }
   0xc   :  { %66 = vmatpush.msra.mxu0 %v61_v0  ;;  %v59_v2 = vld [vmem:[#allocation5 + $0x68] sm:$0xff]  ;;  %v58_v3 = vld [vmem:[#allocation5 + $0x60] sm:$0xff]  ;;  %v57_v4 = vld [vmem:[#allocation5 + $0x58] sm:$0xff]  ;;  %s92_s25 = sshll.u32 %s193_s24, 4  ;;  %s93_s25 = int_to_ptr.vmem [resolvable:$true] %s92_s25 }
   0xd   :  { %v56_v5 = vld [vmem:[#allocation5 + $0x50] sm:$0xff]  ;;  %v55_v6 = vld [vmem:[#allocation5 + $0x48] sm:$0xff]  ;;  %v54_v7 = vld [vmem:[#allocation5 + $0x40] sm:$0xff] }
   0xe   :  { %67 = vmatpush.msra.mxu0 %v60_v1  ;;  %v53_v8 = vld [vmem:[#allocation5 + $0x38] sm:$0xff]  ;;  %v52_v9 = vld [vmem:[#allocation5 + $0x30] sm:$0xff]  ;;  %v51_v10 = vld [vmem:[#allocation5 + $0x28] sm:$0xff] }
   0xf   :  { %v50_v11 = vld [vmem:[#allocation5 + $0x20] sm:$0xff]  ;;  %v49_v12 = vld [vmem:[#allocation5 + $0x18] sm:$0xff]  ;;  %v48_v13 = vld [vmem:[#allocation5 + $0x10] sm:$0xff] }
  0x10   :  { %68 = vmatpush.msra.mxu0 %v59_v2  ;;  %v47_v14 = vld [vmem:[#allocation5 + $0x8] sm:$0xff]  ;;  %v46_v15 = vld [vmem:[#allocation5] sm:$0xff]  ;;  %v45_v16 = vld [vmem:[#allocation2] sm:$0xff] }
  0x11   :  { %v110_v17 = vld [vmem:[%s228_s2] ss:$0 sm:$0xff] }
  0x12   :  { %69 = vmatpush.msra.mxu0 %v58_v3 }
  0x14   :  { %70 = vmatpush.msra.mxu0 %v57_v4 }
  0x16   :  { %71 = vmatpush.msra.mxu0 %v56_v5 }
  0x18   :  { %72 = vmatpush.msra.mxu0 %v55_v6 }
  0x1a   :  { %73 = vmatpush.msra.mxu0 %v54_v7 }
  0x1c   :  { %74 = vmatpush.msra.mxu0 %v53_v8 }
  0x1e   :  { %75 = vmatpush.msra.mxu0 %v52_v9 }
  0x20   :  { %76 = vmatpush.msra.mxu0 %v51_v10 }
  0x22   :  { %77 = vmatpush.msra.mxu0 %v50_v11 }
  0x24   :  { %78 = vmatpush.msra.mxu0 %v49_v12 }
  0x26   :  { %79 = vmatpush.msra.mxu0 %v48_v13 }
  0x28   :  { %80 = vmatpush.msra.mxu0 %v47_v14 }
  0x2a   :  { %81 = vmatpush.msra.mxu0 %v46_v15 }
  0x2b   :  { %82 = vmatmul.f32.vlgmr.msra.gmra.mxu0 %v45_v16 }
  0xa8   :  { %v83_v18 = vpop.f32.mrf.mxu0 }
  0xa9   :  { %v84_v19 = vadd.f32 %v110_v17, %v83_v18 }
  0xab   :  { %86 = vst [vmem:[#allocation7] sm:$0xff] %v84_v19 }
  0xac   :  { %97 = dma.vmem_to_hbm [thread:$0]  %s93_s25, 128, %s95_s28, [#allocation4]  }
  0xad   :  { %187 = dma.done.wait [#allocation4], 128  }
  0xae   :  { %188 = vsyncadd [#allocation4], 4294967168 }
  0xaf   :  { %102 = vsyncpa [#allocation3], 1 }
  0xb0   :  { %103 = vsyncpa [#allocation6], 1 }
  0xb1   :  { %104 = vsyncpa [#allocation4], 1 }

</bundles_post_ra>
